<compile_context>
chip_gen: v7x
topology: tpu7x:2x2x1
jax: 0.10.0
libtpu: 0.0.40
codegen_flags: <defaults>
</compile_context>

<pallas_src>
import jax
import jax.numpy as jnp
import numpy as np
from jax.experimental import pallas as pl
from jax.experimental.pallas import tpu as pltpu

_LANE = 128          # lane width
_MAX_TILE_R = 512    # rows of 128 lanes per block -> 65536 elements / block
_FAST_PATH_N = 8192  # below this, fused XLA elementwise beats kernel launch


def _sublane(dtype) -> int:
    # f32 -> 8, bf16/f16 -> 16, int8/fp8 -> 32
    return max(8, 32 // jnp.dtype(dtype).itemsize)


def _qrot_xz_kernel(qv_ref, o_ref):
    # qv_ref: (7, TILE_R, LANE)  rows = qw, qx, qy, qz, vx, vy, vz
    # o_ref : (2, TILE_R, LANE)  rows = rotated x, rotated z
    qw = qv_ref[0]
    qx = qv_ref[1]
    qy = qv_ref[2]
    qz = qv_ref[3]
    vx = qv_ref[4]
    vy = qv_ref[5]
    vz = qv_ref[6]

    # uv = cross(qvec, v)
    uvx = qy * vz - qz * vy
    uvy = qz * vx - qx * vz
    uvz = qx * vy - qy * vx

    # uuv = cross(qvec, uv)  (only x and z components needed)
    uuvx = qy * uvz - qz * uvy
    uuvz = qx * uvy - qy * uvx

    w2 = qw + qw
    o_ref[0] = vx + w2 * uvx + (uuvx + uuvx)
    o_ref[1] = vz + w2 * uvz + (uuvz + uuvz)


def _reference(velocity, rotations):
    """Pure-JAX fused reference (also the small-N fast path)."""
    qw = rotations[..., 0:1]
    qvec = rotations[..., 1:]
    uv = jnp.cross(qvec, velocity, axis=-1)
    uuv = jnp.cross(qvec, uv, axis=-1)
    rotated = velocity + 2.0 * (qw * uv + uuv)
    return jnp.stack([rotated[..., 0], rotated[..., 2]], axis=-1)


def _round_up(x, m):
    return ((x + m - 1) // m) * m


def linear_velocity_xz(velocity: jax.Array, rotations: jax.Array,
                       *, force_kernel: bool = False) -> jax.Array:
    """velocity: (*, 3), rotations: (*, 4) -> (*, 2) with columns [x, z]."""
    assert rotations.shape[-1] == 4
    assert velocity.shape[-1] == 3
    assert rotations.shape[:-1] == velocity.shape[:-1]

    batch_shape = velocity.shape[:-1]
    n = int(np.prod(batch_shape)) if batch_shape else 1
    dtype = jnp.result_type(velocity, rotations)

    # Small-N fast path: launch/pad/relayout overhead dominates the kernel.
    if not force_kernel and n < _FAST_PATH_N:
        return _reference(velocity.astype(dtype), rotations.astype(dtype))

    sub = _sublane(dtype)

    # --- tile / padding selection ------------------------------------------
    n_rows = max(1, pl.cdiv(n, _LANE))                  # 128-lane rows needed
    tile_r = min(_MAX_TILE_R, _round_up(n_rows, sub))   # sublane-aligned
    R = _round_up(n_rows, tile_r)                       # total padded rows
    n_pad = R * _LANE
    grid = (R // tile_r,)

    # --- build fused component-major slab: pad -> reshape -> transpose ------
    q_flat = rotations.reshape(n, 4).astype(dtype)
    v_flat = velocity.reshape(n, 3).astype(dtype)
    qv = jnp.concatenate([q_flat, v_flat], axis=-1)          # (n, 7)
    qv = jnp.pad(qv, ((0, n_pad - n), (0, 0)))               # (n_pad, 7)
    qv_slab = qv.reshape(R, _LANE, 7).transpose(2, 0, 1)     # (7, R, 128)

    out_slab = pl.pallas_call(
        _qrot_xz_kernel,
        out_shape=jax.ShapeDtypeStruct((2, R, _LANE), dtype),
        grid_spec=pltpu.PrefetchScalarGridSpec(
            num_scalar_prefetch=0,
            grid=grid,
            in_specs=[
                pl.BlockSpec((7, tile_r, _LANE), lambda i: (0, i, 0)),
            ],
            out_specs=pl.BlockSpec((2, tile_r, _LANE), lambda i: (0, i, 0)),
        ),
        compiler_params=pltpu.CompilerParams(
            dimension_semantics=("parallel",),
        ),
    )(qv_slab)

    # (2, R, 128) -> (n_pad, 2) -> (n, 2)
    out = out_slab.transpose(1, 2, 0).reshape(n_pad, 2)[:n]
    return out.reshape(*batch_shape, 2)


if __name__ == "__main__":
    key = jax.random.PRNGKey(0)
    k1, k2, k3, k4 = jax.random.split(key, 4)

    # --- small shape (matches module usage); force the Pallas kernel path ---
    batch, seq = 2, 8
    velocity = jax.random.normal(k1, (batch, seq, 3), dtype=jnp.float32)
    quat = jax.random.normal(k2, (batch, seq, 4), dtype=jnp.float32)
    rotations = quat / jnp.linalg.norm(quat, axis=-1, keepdims=True)

    out = linear_velocity_xz(velocity, rotations, force_kernel=True)
    out = jax.block_until_ready(out)
    ref = _reference(velocity, rotations)
    np.testing.assert_allclose(np.asarray(out), np.asarray(ref),
                               rtol=1e-5, atol=1e-5)
    assert out.shape == (batch, seq, 2)

    # --- larger shape: exercises padding + multi-block grid (default path) --
    B2, S2 = 5, 40960  # n = 204800 -> tile_r=512, R=1600 -> padded, grid>1
    velocity2 = jax.random.normal(k3, (B2, S2, 3), dtype=jnp.float32)
    quat2 = jax.random.normal(k4, (B2, S2, 4), dtype=jnp.float32)
    rotations2 = quat2 / jnp.linalg.norm(quat2, axis=-1, keepdims=True)

    out2 = linear_velocity_xz(velocity2, rotations2)
    out2 = jax.block_until_ready(out2)
    ref2 = _reference(velocity2, rotations2)
    np.testing.assert_allclose(np.asarray(out2), np.asarray(ref2),
                               rtol=1e-5, atol=1e-5)
    assert out2.shape == (B2, S2, 2)

    print("KERNEL_OK")
</pallas_src>

<mosaic_0001>
module attributes {stable_mosaic.version = 11 : i64} {
  func.func @_qrot_xz_kernel(%arg0: i32, %arg1: memref<7x8x128xf32, #tpu.memory_space<vmem>>, %arg2: memref<2x8x128xf32, #tpu.memory_space<vmem>>) attributes {dimension_semantics = [#tpu.dimension_semantics<parallel>], iteration_bounds = array<i64: 1>, scalar_prefetch = 0 : i64, scratch_operands = 0 : i64, tpu.core_type = #tpu.core_type<tc>, window_params = [{transform_indices = @transform_0, window_bounds = array<i64: 7, 8, 128>}, {transform_indices = @transform_1, window_bounds = array<i64: 2, 8, 128>}]} {
    %c0 = arith.constant 0 : index
    %c0_0 = arith.constant 0 : index
    %c0_1 = arith.constant 0 : index
    %0 = vector.load %arg1[%c0, %c0_0, %c0_1] : memref<7x8x128xf32, #tpu.memory_space<vmem>>, vector<1x8x128xf32>
    %1 = vector.shape_cast %0 : vector<1x8x128xf32> to vector<8x128xf32>
    %c1 = arith.constant 1 : index
    %c0_2 = arith.constant 0 : index
    %c0_3 = arith.constant 0 : index
    %2 = vector.load %arg1[%c1, %c0_2, %c0_3] : memref<7x8x128xf32, #tpu.memory_space<vmem>>, vector<1x8x128xf32>
    %3 = vector.shape_cast %2 : vector<1x8x128xf32> to vector<8x128xf32>
    %c2 = arith.constant 2 : index
    %c0_4 = arith.constant 0 : index
    %c0_5 = arith.constant 0 : index
    %4 = vector.load %arg1[%c2, %c0_4, %c0_5] : memref<7x8x128xf32, #tpu.memory_space<vmem>>, vector<1x8x128xf32>
    %5 = vector.shape_cast %4 : vector<1x8x128xf32> to vector<8x128xf32>
    %c3 = arith.constant 3 : index
    %c0_6 = arith.constant 0 : index
    %c0_7 = arith.constant 0 : index
    %6 = vector.load %arg1[%c3, %c0_6, %c0_7] : memref<7x8x128xf32, #tpu.memory_space<vmem>>, vector<1x8x128xf32>
    %7 = vector.shape_cast %6 : vector<1x8x128xf32> to vector<8x128xf32>
    %c4 = arith.constant 4 : index
    %c0_8 = arith.constant 0 : index
    %c0_9 = arith.constant 0 : index
    %8 = vector.load %arg1[%c4, %c0_8, %c0_9] : memref<7x8x128xf32, #tpu.memory_space<vmem>>, vector<1x8x128xf32>
    %9 = vector.shape_cast %8 : vector<1x8x128xf32> to vector<8x128xf32>
    %c5 = arith.constant 5 : index
    %c0_10 = arith.constant 0 : index
    %c0_11 = arith.constant 0 : index
    %10 = vector.load %arg1[%c5, %c0_10, %c0_11] : memref<7x8x128xf32, #tpu.memory_space<vmem>>, vector<1x8x128xf32>
    %11 = vector.shape_cast %10 : vector<1x8x128xf32> to vector<8x128xf32>
    %c6 = arith.constant 6 : index
    %c0_12 = arith.constant 0 : index
    %c0_13 = arith.constant 0 : index
    %12 = vector.load %arg1[%c6, %c0_12, %c0_13] : memref<7x8x128xf32, #tpu.memory_space<vmem>>, vector<1x8x128xf32>
    %13 = vector.shape_cast %12 : vector<1x8x128xf32> to vector<8x128xf32>
    %14 = arith.mulf %5, %13 : vector<8x128xf32>
    %15 = arith.mulf %7, %11 : vector<8x128xf32>
    %16 = arith.subf %14, %15 : vector<8x128xf32>
    %17 = arith.mulf %7, %9 : vector<8x128xf32>
    %18 = arith.mulf %3, %13 : vector<8x128xf32>
    %19 = arith.subf %17, %18 : vector<8x128xf32>
    %20 = arith.mulf %3, %11 : vector<8x128xf32>
    %21 = arith.mulf %5, %9 : vector<8x128xf32>
    %22 = arith.subf %20, %21 : vector<8x128xf32>
    %23 = arith.mulf %5, %22 : vector<8x128xf32>
    %24 = arith.mulf %7, %19 : vector<8x128xf32>
    %25 = arith.subf %23, %24 : vector<8x128xf32>
    %26 = arith.mulf %3, %19 : vector<8x128xf32>
    %27 = arith.mulf %5, %16 : vector<8x128xf32>
    %28 = arith.subf %26, %27 : vector<8x128xf32>
    %29 = arith.addf %1, %1 : vector<8x128xf32>
    %30 = arith.mulf %29, %16 : vector<8x128xf32>
    %31 = arith.addf %9, %30 : vector<8x128xf32>
    %32 = arith.addf %25, %25 : vector<8x128xf32>
    %33 = arith.addf %31, %32 : vector<8x128xf32>
    %c0_14 = arith.constant 0 : index
    %c0_15 = arith.constant 0 : index
    %c0_16 = arith.constant 0 : index
    %34 = vector.load %arg2[%c0_14, %c0_15, %c0_16] : memref<2x8x128xf32, #tpu.memory_space<vmem>>, vector<1x8x128xf32>
    %35 = vector.shape_cast %34 : vector<1x8x128xf32> to vector<8x128xf32>
    %36 = vector.shape_cast %33 : vector<8x128xf32> to vector<1x8x128xf32>
    tpu.vector_store %arg2[%c0_14, %c0_15, %c0_16], %36 {strides = array<i32>} : memref<2x8x128xf32, #tpu.memory_space<vmem>>, vector<1x8x128xf32>,
    %37 = arith.mulf %29, %22 : vector<8x128xf32>
    %38 = arith.addf %13, %37 : vector<8x128xf32>
    %39 = arith.addf %28, %28 : vector<8x128xf32>
    %40 = arith.addf %38, %39 : vector<8x128xf32>
    %c1_17 = arith.constant 1 : index
    %c0_18 = arith.constant 0 : index
    %c0_19 = arith.constant 0 : index
    %41 = vector.load %arg2[%c1_17, %c0_18, %c0_19] : memref<2x8x128xf32, #tpu.memory_space<vmem>>, vector<1x8x128xf32>
    %42 = vector.shape_cast %41 : vector<1x8x128xf32> to vector<8x128xf32>
    %43 = vector.shape_cast %40 : vector<8x128xf32> to vector<1x8x128xf32>
    tpu.vector_store %arg2[%c1_17, %c0_18, %c0_19], %43 {strides = array<i32>} : memref<2x8x128xf32, #tpu.memory_space<vmem>>, vector<1x8x128xf32>,
    return
  }
  func.func @transform_0(%arg0: i32) -> (i32, i32, i32) {
    %c0_i32 = arith.constant 0 : i32
    %c0_i32_0 = arith.constant 0 : i32
    %c0_i32_1 = arith.constant 0 : i32
    return %c0_i32, %arg0, %c0_i32_0 : i32, i32, i32
  }
  func.func @transform_1(%arg0: i32) -> (i32, i32, i32) {
    %c0_i32 = arith.constant 0 : i32
    %c0_i32_0 = arith.constant 0 : i32
    %c0_i32_1 = arith.constant 0 : i32
    return %c0_i32, %arg0, %c0_i32_0 : i32, i32, i32
  }
}

</mosaic_0001>

<bundles_post_ra>
// kernel: tpu_custom_call.1
= control target key start
LH: loop header
LB: loop body
LE: loop exit
PB: predicated region body
PF: predicated region fallthrough
CT: control target
= control target key end

     0   :  { %6 = vsyncpa [#allocation3], 0  ;;  %s176_s0 = inlined_call_operand.hbm [shape: f32[7,8,128], index: 0, kind: input, shape index: {}]   ;;  %s177_s1 = inlined_call_operand.hbm [shape: f32[2,8,128], index: 1, kind: output, shape index: {}]  }
   0x1   :  { %7 = vsyncpa [#allocation4], 0  ;;  %s132_s6 = smov [#allocation2]   ;;  %s84_s10 = scalar_lea.hbm %s176_s0, 896 }
   0x2   :  { %s13_s7 = sshll.u32 %s132_s6, 4  ;;  %p85_p0 = scmp.ne.s32.totalorder %s176_s0, %s84_s10  ;;  %s14_s7 = int_to_ptr.vmem [resolvable:$true] %s13_s7 }
   0x3   :  { %p88_p1 = scmp.lt.u32.totalorder %s84_s10, %s176_s0 }
   0x5   :  { %p90_p2 = pnand %p88_p1, %p85_p0 }
   0x7   :  { %93 = shalt.err (!%p90_p2)
}
   0x8   :  { %s94_s15 = scalar_lea.vmem %s14_s7, 896  ;;  %p99_p4 = scmp.lt.s32.totalorder %s14_s7, %s14_s7 }
   0x9   :  { %p95_p3 = scmp.ne.s32.totalorder %s14_s7, %s94_s15  ;;  %p100_p5 = scmp.lt.s32.totalorder %s94_s15, %s94_s15 }
   0xb   :  { %p101_p6 = por %p100_p5, %p99_p4 }
   0xd   :  { %p102_p7 = pnand %p101_p6, %p95_p3 }
   0xf   :  { %105 = shalt.err (!%p102_p7)
}
  0x10   :  { %s133_s16 = smov 128   ;;  %s134_s17 = smov 8  }
  0x11   :  { %19 = dma.hbm_to_vmem [thread:$0]  %s176_s0, 896, %s14_s7, [#allocation3], %s133_s16, %s133_s16, %s134_s17  }
  0x12   :  { %128 = dma.done.wait [#allocation3], 896  }
  0x13   :  { %129 = vsyncadd [#allocation3], 4294966400  ;;  %v23_v0 = vld [vmem:[#allocation2] sm:$0xff]  ;;  %v25_v1 = vld [vmem:[#allocation2 + $0x8] sm:$0xff]  ;;  %s135_s0 = smov [#allocation5]  }
  0x14   :  { %v27_v2 = vld [vmem:[#allocation2 + $0x10] sm:$0xff]  ;;  %v29_v3 = vld [vmem:[#allocation2 + $0x18] sm:$0xff]  ;;  %v31_v4 = vld [vmem:[#allocation2 + $0x20] sm:$0xff]  ;;  %v51_v6 = vadd.f32 %v23_v0, %v23_v0  ;;  %s68_s20 = sshll.u32 %s135_s0, 4  ;;  %s69_s20 = int_to_ptr.vmem [resolvable:$true] %s68_s20 }
  0x15   :  { %v33_v5 = vld [vmem:[#allocation2 + $0x28] sm:$0xff]  ;;  %v35_v7 = vld [vmem:[#allocation2 + $0x30] sm:$0xff]  ;;  %v39_v9 = vmul.f32 %v31_v4, %v29_v3  ;;  %v43_v11 = vmul.f32 %v31_v4, %v27_v2  ;;  %s106_s21 = scalar_lea.vmem %s69_s20, 256  ;;  %p111_p9 = scmp.lt.s32.totalorder %s69_s20, %s69_s20 }
  0x16   :  { %v37_v8 = vmul.f32 %v33_v5, %v29_v3  ;;  %v42_v10 = vmul.f32 %v33_v5, %v25_v1  ;;  %v36_v12 = vmul.f32 %v35_v7, %v27_v2  ;;  %v40_v13 = vmul.f32 %v35_v7, %v25_v1  ;;  %p107_p8 = scmp.ne.s32.totalorder %s69_s20, %s106_s21  ;;  %p112_p10 = scmp.lt.s32.totalorder %s106_s21, %s106_s21 }
  0x18   :  { %v44_v14 = vsub.f32 %v42_v10, %v43_v11  ;;  %v38_v15 = vsub.f32 %v36_v12, %v37_v8  ;;  %v41_v16 = vsub.f32 %v39_v9, %v40_v13  ;;  %p113_p11 = por %p112_p10, %p111_p9 }
  0x1a   :  { %v45_v17 = vmul.f32 %v44_v14, %v27_v2  ;;  %v57_v18 = vmul.f32 %v51_v6, %v44_v14  ;;  %v46_v19 = vmul.f32 %v41_v16, %v29_v3  ;;  %v52_v20 = vmul.f32 %v51_v6, %v38_v15  ;;  %p114_p12 = pnand %p113_p11, %p107_p8 }
  0x1b   :  { %v48_v21 = vmul.f32 %v41_v16, %v25_v1  ;;  %v49_v22 = vmul.f32 %v38_v15, %v27_v2 }
  0x1c   :  { %v47_v23 = vsub.f32 %v45_v17, %v46_v19  ;;  %v53_v24 = vadd.f32 %v52_v20, %v31_v4  ;;  %v58_v26 = vadd.f32 %v57_v18, %v35_v7 }
  0x1d   :  { %v50_v25 = vsub.f32 %v48_v21, %v49_v22 }
  0x1e   :  { %v54_v27 = vadd.f32 %v47_v23, %v47_v23 }
  0x1f   :  { %v59_v28 = vadd.f32 %v50_v25, %v50_v25 }
  0x20   :  { %v55_v29 = vadd.f32 %v54_v27, %v53_v24 }
  0x21   :  { %v60_v30 = vadd.f32 %v59_v28, %v58_v26 }
  0x22   :  { %56 = vst [vmem:[#allocation5] sm:$0xff] %v55_v29 }
  0x23   :  { %62 = vst [vmem:[#allocation5 + $0x8] sm:$0xff] %v60_v30 }
  0x24   :  { %117 = shalt.err (!%p114_p12)
}
  0x25   :  { %s118_s24 = scalar_lea.hbm %s177_s1, 256 }
  0x26   :  { %p119_p13 = scmp.ne.s32.totalorder %s177_s1, %s118_s24  ;;  %p122_p0 = scmp.lt.u32.totalorder %s118_s24, %s177_s1 }
  0x28   :  { %p124_p1 = pnand %p122_p0, %p119_p13 }
  0x2a   :  { %127 = shalt.err (!%p124_p1)
}
  0x2b   :  { %74 = dma.vmem_to_hbm [thread:$0]  %s69_s20, 256, %s177_s1, [#allocation4], %s133_s16, %s133_s16, %s134_s17  }
  0x2c   :  { %130 = dma.done.wait [#allocation4], 256  }
  0x2d   :  { %131 = vsyncadd [#allocation4], 4294967040 }
  0x2e   :  { %78 = vsyncpa [#allocation3], 1 }
  0x2f   :  { %79 = vsyncpa [#allocation4], 1 }

</bundles_post_ra>
